<compile_context>
chip_gen: v6e
topology: v6e:2x2x1
jax: 0.10.0
libtpu: 0.0.40
codegen_flags: <defaults>
</compile_context>

<pallas_src>
import jax
import jax.numpy as jnp
from jax.experimental import pallas as pl
from jax.experimental.pallas import tpu as pltpu

# ---- model dims (EmolabelEncoder defaults) ----
IN_DIM = 1
H1 = 16
H2 = 32
H3 = 16
OUT_DIM = 32

GROUP = 8                       # batch rows packed per lane group
GH1 = GROUP * H1                # 128
GH2 = GROUP * H2                # 256
GH3 = GROUP * H3                # 128
GOUT = GROUP * OUT_DIM          # 256
PACK_W = max(GH1, GH2, GH3, GOUT)   # 256 lane width of the packed bias array
ROW_ALIGN = 8 * GROUP           # batch tile must keep (bt/G) a multiple of 8


def _round_up(n, m):
    return ((n + m - 1) // m) * m


def emolabel_kernel(x_ref, w1_ref, w2_ref, w3_ref, w4_ref, bias_ref, o_ref):
    x = x_ref[...]                           # (bt/G, G) lane-grouped inputs
    biases = bias_ref[...]                   # (4, 256) packed, group-tiled biases

    b1 = biases[0:1, :GH1]                   # (1, 128)
    b2 = biases[1:2, :GH2]                   # (1, 256)
    b3 = biases[2:3, :GH3]                   # (1, 128)
    b4 = biases[3:4, :GOUT]                  # (1, 256)

    # All weights are block-diagonal (kron(I_G, W)) so every dot is lane-dense.
    # Layer 1: (bt/G, G) @ (G, 128)
    h = jnp.maximum(
        jnp.dot(x, w1_ref[...], preferred_element_type=jnp.float32) + b1, 0.0)
    # Layer 2: (bt/G, 128) @ (128, 256)
    h = jnp.maximum(
        jnp.dot(h, w2_ref[...], preferred_element_type=jnp.float32) + b2, 0.0)
    # Layer 3: (bt/G, 256) @ (256, 128)
    h = jnp.maximum(
        jnp.dot(h, w3_ref[...], preferred_element_type=jnp.float32) + b3, 0.0)
    # Layer 4 (no activation): (bt/G, 128) @ (128, 256) -> unmasked 256-lane store
    o_ref[...] = jnp.dot(h, w4_ref[...], preferred_element_type=jnp.float32) + b4


def emolabel_forward(x, params, *, bt=8192):
    """x: (B, 1) float32.  params: (w1_blk, w2_blk, w3_blk, w4_blk, bias_pack)."""
    w1b, w2b, w3b, w4b, bias_pack = params
    B = x.shape[0]
    assert x.shape[1] == IN_DIM

    # Batch tile: multiple of 8*G, clamped for small batches; when the batch is
    # big enough, force >=2 grid steps so both v7x TensorCores are used.
    b_min_pad = _round_up(B, ROW_ALIGN)
    bt = max(ROW_ALIGN, _round_up(min(bt, b_min_pad), ROW_ALIGN))
    if b_min_pad >= 2 * ROW_ALIGN:
        bt = min(bt, _round_up(b_min_pad // 2, ROW_ALIGN))
    B_pad = _round_up(B, bt)

    if B_pad != B:
        x = jnp.pad(x, ((0, B_pad - B), (0, 0)))

    # Lane-group view of the batch: row i holds inputs for rows i*G .. i*G+G-1.
    x_grp = x.reshape(B_pad // GROUP, GROUP)
    bt_g = bt // GROUP

    cost = pl.CostEstimate(
        flops=3104 * B_pad,                       # useful (non-block-diag) flops
        transcendentals=0,
        bytes_accessed=132 * B_pad + 400 * 1024,  # x read + out write + weights
    )

    out_grp = pl.pallas_call(
        emolabel_kernel,
        out_shape=jax.ShapeDtypeStruct((B_pad // GROUP, GOUT), jnp.float32),
        grid_spec=pltpu.PrefetchScalarGridSpec(
            num_scalar_prefetch=0,
            grid=(B_pad // bt,),
            in_specs=[
                pl.BlockSpec((bt_g, GROUP), lambda i: (i, 0)),   # x, lane-grouped
                pl.BlockSpec((GROUP, GH1), lambda i: (0, 0)),    # W1 block-diag
                pl.BlockSpec((GH1, GH2), lambda i: (0, 0)),      # W2 block-diag
                pl.BlockSpec((GH2, GH3), lambda i: (0, 0)),      # W3 block-diag
                pl.BlockSpec((GH3, GOUT), lambda i: (0, 0)),     # W4 block-diag
                pl.BlockSpec((4, PACK_W), lambda i: (0, 0)),     # packed biases
            ],
            out_specs=pl.BlockSpec((bt_g, GOUT), lambda i: (i, 0)),
        ),
        compiler_params=pltpu.CompilerParams(
            dimension_semantics=("parallel",),
            vmem_limit_bytes=32 * 1024 * 1024,
        ),
        cost_estimate=cost,
    )(x_grp, w1b, w2b, w3b, w4b, bias_pack)

    # (B_pad/G, G*32) -> (B_pad, 32): pure view change, rows come back in order.
    return out_grp.reshape(B_pad, OUT_DIM)[:B]


def init_params(key):
    """Deterministic synthetic parameters (PyTorch-Linear-style uniform init)."""
    ks = jax.random.split(key, 8)

    def lin(k, fan_in, shape):
        bound = 1.0 / (fan_in ** 0.5)
        return jax.random.uniform(k, shape, jnp.float32, -bound, bound)

    w1 = lin(ks[0], IN_DIM, (IN_DIM, H1))        # (1, 16), x @ W layout
    b1 = lin(ks[1], IN_DIM, (H1,))
    w2 = lin(ks[2], H1, (H1, H2))
    b2 = lin(ks[3], H1, (H2,))
    w3 = lin(ks[4], H2, (H2, H3))
    b3 = lin(ks[5], H2, (H3,))
    w4 = lin(ks[6], H3, (H3, OUT_DIM))
    b4 = lin(ks[7], H3, (OUT_DIM,))
    raw = (w1, b1, w2, b2, w3, b3, w4, b4)

    # Block-diagonal (lane-packed) weights: kron(I_G, W).
    eye = jnp.eye(GROUP, dtype=jnp.float32)
    w1b = jnp.kron(eye, w1)                      # (G, G*16)
    w2b = jnp.kron(eye, w2)                      # (G*16, G*32)
    w3b = jnp.kron(eye, w3)                      # (G*32, G*16)
    w4b = jnp.kron(eye, w4)                      # (G*16, G*32)

    # Group-tiled biases packed into one (4, 256) array, rows left-aligned.
    def pack_row(v):
        v = jnp.tile(v, GROUP)
        return jnp.pad(v, (0, PACK_W - v.size)).reshape(1, PACK_W)

    bias_pack = jnp.concatenate(
        [pack_row(b1), pack_row(b2), pack_row(b3), pack_row(b4)], axis=0)

    packed = (w1b, w2b, w3b, w4b, bias_pack)
    return packed, raw


def reference_forward(x, raw_params):
    """Pure-JAX reference of the same MLP, for correctness checking."""
    w1, b1, w2, b2, w3, b3, w4, b4 = raw_params
    h = jnp.maximum(x @ w1 + b1, 0.0)
    h = jnp.maximum(h @ w2 + b2, 0.0)
    h = jnp.maximum(h @ w3 + b3, 0.0)
    return h @ w4 + b4


if __name__ == "__main__":
    key = jax.random.PRNGKey(0)
    k_x, k_p = jax.random.split(key)

    packed, raw = init_params(k_p)

    # Small batch (single grid step, padded to the 64-row alignment).
    B = 16
    x = jax.random.normal(k_x, (B, IN_DIM), jnp.float32)
    out = jax.block_until_ready(emolabel_forward(x, packed))
    ref = reference_forward(x, raw)
    assert out.shape == (B, OUT_DIM), f"bad output shape {out.shape}"
    assert jnp.allclose(out, ref, atol=1e-5, rtol=1e-5), "mismatch (small batch)"

    # Ragged batch exercising padding + a multi-step ("parallel") grid.
    B2 = 200
    x2 = jax.random.normal(jax.random.PRNGKey(1), (B2, IN_DIM), jnp.float32)
    out2 = jax.block_until_ready(emolabel_forward(x2, packed, bt=128))
    ref2 = reference_forward(x2, raw)
    assert out2.shape == (B2, OUT_DIM), f"bad output shape {out2.shape}"
    assert jnp.allclose(out2, ref2, atol=1e-5, rtol=1e-5), "mismatch (multi-tile)"

    print("KERNEL_OK")
</pallas_src>

<mosaic_0001>
module attributes {stable_mosaic.version = 11 : i64} {
  func.func @emolabel_kernel(%arg0: i32, %arg1: memref<8x8xf32, #tpu.memory_space<vmem>>, %arg2: memref<8x128xf32, #tpu.memory_space<vmem>>, %arg3: memref<128x256xf32, #tpu.memory_space<vmem>>, %arg4: memref<256x128xf32, #tpu.memory_space<vmem>>, %arg5: memref<128x256xf32, #tpu.memory_space<vmem>>, %arg6: memref<4x256xf32, #tpu.memory_space<vmem>>, %arg7: memref<8x256xf32, #tpu.memory_space<vmem>>) attributes {dimension_semantics = [#tpu.dimension_semantics<parallel>], iteration_bounds = array<i64: 1>, scalar_prefetch = 0 : i64, scratch_operands = 0 : i64, tpu.core_type = #tpu.core_type<tc>, window_params = [{transform_indices = @transform_0, window_bounds = array<i64: 8, 8>}, {pipeline_mode = #tpu.pipeline_mode<synchronous>, transform_indices = @transform_1, window_bounds = array<i64: 8, 128>}, {pipeline_mode = #tpu.pipeline_mode<synchronous>, transform_indices = @transform_2, window_bounds = array<i64: 128, 256>}, {pipeline_mode = #tpu.pipeline_mode<synchronous>, transform_indices = @transform_3, window_bounds = array<i64: 256, 128>}, {pipeline_mode = #tpu.pipeline_mode<synchronous>, transform_indices = @transform_4, window_bounds = array<i64: 128, 256>}, {pipeline_mode = #tpu.pipeline_mode<synchronous>, transform_indices = @transform_5, window_bounds = array<i64: 4, 256>}, {transform_indices = @transform_6, window_bounds = array<i64: 8, 256>}]} {
    %c0 = arith.constant 0 : index
    %c0_0 = arith.constant 0 : index
    %0 = vector.load %arg1[%c0, %c0_0] : memref<8x8xf32, #tpu.memory_space<vmem>>, vector<8x8xf32>
    %c0_1 = arith.constant 0 : index
    %c0_2 = arith.constant 0 : index
    %1 = vector.load %arg6[%c0_1, %c0_2] : memref<4x256xf32, #tpu.memory_space<vmem>>, vector<4x256xf32>
    %2 = vector.extract_strided_slice %1 {offsets = [0, 0], sizes = [1, 128], strides = [1, 1]} : vector<4x256xf32> to vector<1x128xf32>
    %3 = vector.extract_strided_slice %1 {offsets = [1, 0], sizes = [1, 256], strides = [1, 1]} : vector<4x256xf32> to vector<1x256xf32>
    %4 = vector.extract_strided_slice %1 {offsets = [2, 0], sizes = [1, 128], strides = [1, 1]} : vector<4x256xf32> to vector<1x128xf32>
    %5 = vector.extract_strided_slice %1 {offsets = [3, 0], sizes = [1, 256], strides = [1, 1]} : vector<4x256xf32> to vector<1x256xf32>
    %c0_3 = arith.constant 0 : index
    %c0_4 = arith.constant 0 : index
    %6 = vector.load %arg2[%c0_3, %c0_4] : memref<8x128xf32, #tpu.memory_space<vmem>>, vector<8x128xf32>
    %cst = arith.constant dense<0.000000e+00> : vector<8x128xf32>
    %7 = tpu.matmul %0, %6, %cst {dimension_numbers = #tpu.dot_dimension_numbers<[1], [0], [0], [1], [0, 0, 1, 1], [], []>} : vector<8x8xf32>, vector<8x128xf32>, vector<8x128xf32> -> vector<8x128xf32>
    %8 = vector.broadcast %2 : vector<1x128xf32> to vector<8x128xf32>
    %9 = arith.addf %7, %8 : vector<8x128xf32>
    %cst_5 = arith.constant 0.000000e+00 : f32
    %10 = vector.broadcast %cst_5 : f32 to vector<8x128xf32>
    %11 = arith.maximumf %9, %10 : vector<8x128xf32>
    %c0_6 = arith.constant 0 : index
    %c0_7 = arith.constant 0 : index
    %12 = vector.load %arg3[%c0_6, %c0_7] : memref<128x256xf32, #tpu.memory_space<vmem>>, vector<128x256xf32>
    %cst_8 = arith.constant dense<0.000000e+00> : vector<8x256xf32>
    %13 = tpu.matmul %11, %12, %cst_8 {dimension_numbers = #tpu.dot_dimension_numbers<[1], [0], [0], [1], [0, 0, 1, 1], [], []>} : vector<8x128xf32>, vector<128x256xf32>, vector<8x256xf32> -> vector<8x256xf32>
    %14 = vector.broadcast %3 : vector<1x256xf32> to vector<8x256xf32>
    %15 = arith.addf %13, %14 : vector<8x256xf32>
    %cst_9 = arith.constant 0.000000e+00 : f32
    %16 = vector.broadcast %cst_9 : f32 to vector<8x256xf32>
    %17 = arith.maximumf %15, %16 : vector<8x256xf32>
    %c0_10 = arith.constant 0 : index
    %c0_11 = arith.constant 0 : index
    %18 = vector.load %arg4[%c0_10, %c0_11] : memref<256x128xf32, #tpu.memory_space<vmem>>, vector<256x128xf32>
    %cst_12 = arith.constant dense<0.000000e+00> : vector<8x128xf32>
    %19 = tpu.matmul %17, %18, %cst_12 {dimension_numbers = #tpu.dot_dimension_numbers<[1], [0], [0], [1], [0, 0, 1, 1], [], []>} : vector<8x256xf32>, vector<256x128xf32>, vector<8x128xf32> -> vector<8x128xf32>
    %20 = vector.broadcast %4 : vector<1x128xf32> to vector<8x128xf32>
    %21 = arith.addf %19, %20 : vector<8x128xf32>
    %cst_13 = arith.constant 0.000000e+00 : f32
    %22 = vector.broadcast %cst_13 : f32 to vector<8x128xf32>
    %23 = arith.maximumf %21, %22 : vector<8x128xf32>
    %c0_14 = arith.constant 0 : index
    %c0_15 = arith.constant 0 : index
    %24 = vector.load %arg5[%c0_14, %c0_15] : memref<128x256xf32, #tpu.memory_space<vmem>>, vector<128x256xf32>
    %cst_16 = arith.constant dense<0.000000e+00> : vector<8x256xf32>
    %25 = tpu.matmul %23, %24, %cst_16 {dimension_numbers = #tpu.dot_dimension_numbers<[1], [0], [0], [1], [0, 0, 1, 1], [], []>} : vector<8x128xf32>, vector<128x256xf32>, vector<8x256xf32> -> vector<8x256xf32>
    %26 = vector.broadcast %5 : vector<1x256xf32> to vector<8x256xf32>
    %27 = arith.addf %25, %26 : vector<8x256xf32>
    %c0_17 = arith.constant 0 : index
    %c0_18 = arith.constant 0 : index
    %28 = vector.load %arg7[%c0_17, %c0_18] : memref<8x256xf32, #tpu.memory_space<vmem>>, vector<8x256xf32>
    tpu.vector_store %arg7[%c0_17, %c0_18], %27 {strides = array<i32>} : memref<8x256xf32, #tpu.memory_space<vmem>>, vector<8x256xf32>,
    return
  }
  func.func @transform_0(%arg0: i32) -> (i32, i32) {
    %c0_i32 = arith.constant 0 : i32
    %c0_i32_0 = arith.constant 0 : i32
    return %arg0, %c0_i32 : i32, i32
  }
  func.func @transform_1(%arg0: i32) -> (i32, i32) {
    %c0_i32 = arith.constant 0 : i32
    %c0_i32_0 = arith.constant 0 : i32
    %c0_i32_1 = arith.constant 0 : i32
    return %c0_i32, %c0_i32_0 : i32, i32
  }
  func.func @transform_2(%arg0: i32) -> (i32, i32) {
    %c0_i32 = arith.constant 0 : i32
    %c0_i32_0 = arith.constant 0 : i32
    %c0_i32_1 = arith.constant 0 : i32
    return %c0_i32, %c0_i32_0 : i32, i32
  }
  func.func @transform_3(%arg0: i32) -> (i32, i32) {
    %c0_i32 = arith.constant 0 : i32
    %c0_i32_0 = arith.constant 0 : i32
    %c0_i32_1 = arith.constant 0 : i32
    return %c0_i32, %c0_i32_0 : i32, i32
  }
  func.func @transform_4(%arg0: i32) -> (i32, i32) {
    %c0_i32 = arith.constant 0 : i32
    %c0_i32_0 = arith.constant 0 : i32
    %c0_i32_1 = arith.constant 0 : i32
    return %c0_i32, %c0_i32_0 : i32, i32
  }
  func.func @transform_5(%arg0: i32) -> (i32, i32) {
    %c0_i32 = arith.constant 0 : i32
    %c0_i32_0 = arith.constant 0 : i32
    %c0_i32_1 = arith.constant 0 : i32
    return %c0_i32, %c0_i32_0 : i32, i32
  }
  func.func @transform_6(%arg0: i32) -> (i32, i32) {
    %c0_i32 = arith.constant 0 : i32
    %c0_i32_0 = arith.constant 0 : i32
    return %arg0, %c0_i32 : i32, i32
  }
}

</mosaic_0001>

<bundles_post_ra>
// kernel: tpu_custom_call.1
= control target key start
LH: loop header
LB: loop body
LE: loop exit
PB: predicated region body
PF: predicated region fallthrough
CT: control target
= control target key end

     0   :  { %11 = vsyncpa [#allocation3], 0  ;;  %s812_s0 = inlined_call_operand.hbm [shape: f32[8,8], index: 0, kind: input, shape index: {}]   ;;  %s813_s1 = inlined_call_operand.hbm [shape: f32[8,128], index: 1, kind: input, shape index: {}]   ;;  %s814_s2 = inlined_call_operand.hbm [shape: f32[128,256], index: 2, kind: input, shape index: {}]   ;;  %s815_s3 = inlined_call_operand.hbm [shape: f32[256,128], index: 3, kind: input, shape index: {}]   ;;  %s816_s4 = inlined_call_operand.hbm [shape: f32[128,256], index: 4, kind: input, shape index: {}]   ;;  %s817_s5 = inlined_call_operand.vmem [shape: f32[4,256], index: 5, kind: input, shape index: {}]   ;;  %s818_s6 = inlined_call_operand.hbm [shape: f32[8,256], index: 6, kind: output, shape index: {}]  }
   0x1   :  { %12 = vsyncpa [#allocation6], 0 }
   0x2   :  { %13 = vsyncpa [#allocation9], 0 }
   0x3   :  { %14 = vsyncpa [#allocation4], 0  ;;  %s724_s21 = smov [#allocation5]   ;;  %s725_s23 = smov [#allocation8]  }
   0x4   :  { %s31_s22 = sshll.u32 %s724_s21, 4  ;;  %s52_s24 = sshll.u32 %s725_s23, 4  ;;  %s32_s22 = int_to_ptr.vmem [resolvable:$true] %s31_s22  ;;  %s53_s24 = int_to_ptr.vmem [resolvable:$true] %s52_s24 }
   0x5   :  { %s604_s25 = scalar_lea.vmem %s32_s22, 128  ;;  %p609_p1 = scmp.lt.s32.totalorder %s32_s22, %s32_s22 }
   0x6   :  { %p605_p0 = scmp.ne.s32.totalorder %s32_s22, %s604_s25  ;;  %p610_p2 = scmp.lt.s32.totalorder %s604_s25, %s604_s25 }
   0x8   :  { %p611_p3 = por %p610_p2, %p609_p1 }
   0xa   :  { %p612_p4 = pnand %p611_p3, %p605_p0 }
   0xc   :  { %615 = shalt.err (!%p612_p4)
}
   0xd   :  { %34 = dma.hbm_to_vmem [thread:$0]  %s813_s1, 128, %s32_s22, [#allocation6]  }
   0xe   :  { %s624_s28 = scalar_lea.vmem %s53_s24, 4096  ;;  %p629_p6 = scmp.lt.s32.totalorder %s53_s24, %s53_s24 }
   0xf   :  { %p625_p5 = scmp.ne.s32.totalorder %s53_s24, %s624_s28  ;;  %p630_p7 = scmp.lt.s32.totalorder %s624_s28, %s624_s28 }
  0x11   :  { %p631_p8 = por %p630_p7, %p629_p6 }
  0x13   :  { %p632_p9 = pnand %p631_p8, %p625_p5 }
  0x15   :  { %635 = shalt.err (!%p632_p9)
}
  0x16   :  { %s726_s29 = smov 128   ;;  %s727_s30 = smov 8  }
  0x17   :  { %58 = dma.hbm_to_vmem [thread:$0]  %s815_s3, 4096, %s53_s24, [#allocation9], %s726_s29, %s726_s29, %s727_s30  }
  0x18   :  { %s728_s9 = smov [#allocation2]   ;;  %s729_s11 = smov [#allocation7]  }
  0x19   :  { %s21_s10 = sshll.u32 %s728_s9, 4  ;;  %s40_s12 = sshll.u32 %s729_s11, 4  ;;  %s22_s10 = int_to_ptr.vmem [resolvable:$true] %s21_s10  ;;  %s41_s12 = int_to_ptr.vmem [resolvable:$true] %s40_s12 }
  0x1a   :  { %s644_s1 = scalar_lea.vmem %s22_s10, 128  ;;  %p649_p11 = scmp.lt.s32.totalorder %s22_s10, %s22_s10 }
  0x1b   :  { %p645_p10 = scmp.ne.s32.totalorder %s22_s10, %s644_s1  ;;  %p650_p12 = scmp.lt.s32.totalorder %s644_s1, %s644_s1 }
  0x1d   :  { %p651_p13 = por %p650_p12, %p649_p11 }
  0x1f   :  { %p652_p0 = pnand %p651_p13, %p645_p10 }
  0x21   :  { %655 = shalt.err (!%p652_p0)
}
  0x22   :  { %24 = dma.hbm_to_vmem [thread:$0]  %s812_s0, 128, %s22_s10, [#allocation3]  }
  0x23   :  { %s664_s15 = scalar_lea.vmem %s41_s12, 4096  ;;  %p669_p2 = scmp.lt.s32.totalorder %s41_s12, %s41_s12 }
  0x24   :  { %p665_p1 = scmp.ne.s32.totalorder %s41_s12, %s664_s15  ;;  %p670_p3 = scmp.lt.s32.totalorder %s664_s15, %s664_s15 }
  0x26   :  { %p671_p4 = por %p670_p3, %p669_p2 }
  0x28   :  { %p672_p5 = pnand %p671_p4, %p665_p1 }
  0x2a   :  { %675 = shalt.err (!%p672_p5)
}
  0x2b   :  { %s730_s3 = smov 256   ;;  %s731_s16 = smov 16  }
  0x2c   :  { %46 = dma.hbm_to_vmem [thread:$0]  %s814_s2, 4096, %s41_s12, [#allocation6], %s730_s3, %s730_s3, %s731_s16  }
  0x2d   :  { %s732_s19 = smov [#allocation10]  }
  0x2e   :  { %s64_s20 = sshll.u32 %s732_s19, 4  ;;  %s65_s20 = int_to_ptr.vmem [resolvable:$true] %s64_s20 }
  0x2f   :  { %s684_s21 = scalar_lea.vmem %s65_s20, 4096  ;;  %p689_p7 = scmp.lt.s32.totalorder %s65_s20, %s65_s20 }
  0x30   :  { %p685_p6 = scmp.ne.s32.totalorder %s65_s20, %s684_s21  ;;  %p690_p8 = scmp.lt.s32.totalorder %s684_s21, %s684_s21 }
  0x32   :  { %p691_p9 = por %p690_p8, %p689_p7 }
  0x34   :  { %p692_p10 = pnand %p691_p9, %p685_p6 }
  0x36   :  { %695 = shalt.err (!%p692_p10)
}
  0x37   :  { %70 = dma.hbm_to_vmem [thread:$0]  %s816_s4, 4096, %s65_s20, [#allocation9], %s730_s3, %s730_s3, %s731_s16  }
  0x38   :  { %716 = dma.done.wait [#allocation3], 128  }
  0x39   :  { %717 = vsyncadd [#allocation3], 4294967168 }
  0x3a   :  { %718 = dma.done.wait [#allocation6], 4224  }
  0x3b   :  { %719 = vsyncadd [#allocation6], 4294963072 }
  0x3c   :  { %720 = dma.done.wait [#allocation9], 8192  }
  0x3d   :  { %721 = vsyncadd [#allocation9], 4294959104  ;;  %v733_v0 = vmov 0.0   ;;  %vm734_vm0 = vmmov 0   ;;  %vm95_vm1 = vcmask 64512   ;;  %v90_v1 = vld [vmem:[#allocation5] sm:$0xff]  ;;  %v91_v59 = vlaneseq }
  0x3e   :  { %579 = vmatprep.subr.mxu0 %v733_v0  ;;  %581 = vmatprep.mubr.msk.f32.mxu0 %vm734_vm0, %v733_v0  ;;  %v88_v2 = vld [vmem:[#allocation2] sm:$0xff]  ;;  %v201_v3 = vld [vmem:[#allocation7 + $0xf8] sm:$0xff]  ;;  %v199_v5 = vld [vmem:[#allocation7 + $0xe8] sm:$0xff] }
  0x3f   :  { %285 = vmatprep.mubr.f32.mxu1 %v733_v0  ;;  %580 = vmatpush3.msra.mxu0 %v90_v1  ;;  %v200_v4 = vld [vmem:[#allocation7 + $0xf0] sm:$0xff]  ;;  %v198_v6 = vld [vmem:[#allocation7 + $0xe0] sm:$0xff]  ;;  %v197_v7 = vld [vmem:[#allocation7 + $0xd8] sm:$0xff]  ;;  %v789_v60 = vshrl.u32 %v91_v59, 7 }
  0x40   :  { %221 = vmatprep.subr.mxu1 %v201_v3  ;;  %582 = vmatmul.mubr.msk.f32.vlgmr.msra.gmra.mxu0 %vm95_vm1, %v88_v2  ;;  %v196_v8 = vld [vmem:[#allocation7 + $0xd0] sm:$0xff]  ;;  %v195_v9 = vld [vmem:[#allocation7 + $0xc8] sm:$0xff]  ;;  %v194_v10 = vld [vmem:[#allocation7 + $0xc0] sm:$0xff] }
  0x41   :  { %222 = vmatpush1.msra.mxu1 %v200_v4  ;;  %v193_v11 = vld [vmem:[#allocation7 + $0xb8] sm:$0xff]  ;;  %v192_v12 = vld [vmem:[#allocation7 + $0xb0] sm:$0xff]  ;;  %v191_v13 = vld [vmem:[#allocation7 + $0xa8] sm:$0xff]  ;;  %v93_v61 = vsub.s32 0, %v789_v60 }
  0x42   :  { %223 = vmatprep.subr.mxu1 %v199_v5  ;;  %v190_v14 = vld [vmem:[#allocation7 + $0xa0] sm:$0xff]  ;;  %v189_v15 = vld [vmem:[#allocation7 + $0x98] sm:$0xff]  ;;  %v188_v16 = vld [vmem:[#allocation7 + $0x90] sm:$0xff] }
  0x43   :  { %224 = vmatpush1.msra.mxu1 %v198_v6  ;;  %v187_v17 = vld [vmem:[#allocation7 + $0x88] sm:$0xff]  ;;  %v186_v18 = vld [vmem:[#allocation7 + $0x80] sm:$0xff]  ;;  %v185_v19 = vld [vmem:[#allocation7 + $0x78] sm:$0xff] }
  0x44   :  { %225 = vmatprep.subr.mxu1 %v197_v7  ;;  %v184_v20 = vld [vmem:[#allocation7 + $0x70] sm:$0xff]  ;;  %v183_v21 = vld [vmem:[#allocation7 + $0x68] sm:$0xff]  ;;  %v182_v22 = vld [vmem:[#allocation7 + $0x60] sm:$0xff] }
  0x45   :  { %226 = vmatpush1.msra.mxu1 %v196_v8  ;;  %v181_v23 = vld [vmem:[#allocation7 + $0x58] sm:$0xff]  ;;  %v180_v24 = vld [vmem:[#allocation7 + $0x50] sm:$0xff]  ;;  %v179_v25 = vld [vmem:[#allocation7 + $0x48] sm:$0xff] }
  0x46   :  { %227 = vmatprep.subr.mxu1 %v195_v9  ;;  %v178_v26 = vld [vmem:[#allocation7 + $0x40] sm:$0xff]  ;;  %v177_v27 = vld [vmem:[#allocation7 + $0x38] sm:$0xff]  ;;  %v176_v28 = vld [vmem:[#allocation7 + $0x30] sm:$0xff] }
  0x47   :  { %228 = vmatpush1.msra.mxu1 %v194_v10  ;;  %v175_v29 = vld [vmem:[#allocation7 + $0x28] sm:$0xff]  ;;  %v174_v30 = vld [vmem:[#allocation7 + $0x20] sm:$0xff]  ;;  %v173_v31 = vld [vmem:[#allocation7 + $0x18] sm:$0xff] }
  0x48   :  { %229 = vmatprep.subr.mxu1 %v193_v11  ;;  %v172_v32 = vld [vmem:[#allocation7 + $0x10] sm:$0xff]  ;;  %v171_v33 = vld [vmem:[#allocation7 + $0x8] sm:$0xff]  ;;  %v170_v34 = vld [vmem:[#allocation7] sm:$0xff] }
  0x49   :  { %230 = vmatpush1.msra.mxu1 %v192_v12  ;;  %v325_v35 = vld [vmem:[#allocation8 + $0xf8] sm:$0xff]  ;;  %v324_v37 = vld [vmem:[#allocation8 + $0xf0] sm:$0xff]  ;;  %v323_v39 = vld [vmem:[#allocation8 + $0xe8] sm:$0xff] }
  0x4a   :  { %231 = vmatprep.subr.mxu1 %v191_v13  ;;  %v309_v36 = vld [vmem:[#allocation8 + $0x78] sm:$0xff]  ;;  %544 = vmatprep.subr.mxu0 %v325_v35  ;;  %v308_v38 = vld [vmem:[#allocation8 + $0x70] sm:$0xff]  ;;  %v307_v40 = vld [vmem:[#allocation8 + $0x68] sm:$0xff]  ;;  %v205_v35 = vsub.s32 1, %v789_v60 }
  0x4b   :  { %232 = vmatpush1.msra.mxu1 %v190_v14  ;;  %545 = vmatpush3.msra.mxu0 %v309_v36  ;;  %v322_v41 = vld [vmem:[#allocation8 + $0xe0] sm:$0xff]  ;;  %v321_v43 = vld [vmem:[#allocation8 + $0xd8] sm:$0xff]  ;;  %v320_v45 = vld [vmem:[#allocation8 + $0xd0] sm:$0xff]  ;;  %v209_v36 = vsub.s32 5, %v789_v60 }
  0x4c   :  { %233 = vmatprep.subr.mxu1 %v189_v15  ;;  %546 = vmatprep.subr.mxu0 %v324_v37  ;;  %v306_v42 = vld [vmem:[#allocation8 + $0x60] sm:$0xff]  ;;  %v305_v44 = vld [vmem:[#allocation8 + $0x58] sm:$0xff]  ;;  %v304_v46 = vld [vmem:[#allocation8 + $0x50] sm:$0xff] }
  0x4d   :  { %234 = vmatpush1.msra.mxu1 %v188_v16  ;;  %547 = vmatpush3.msra.mxu0 %v308_v38  ;;  %v319_v47 = vld [vmem:[#allocation8 + $0xc8] sm:$0xff]  ;;  %v318_v49 = vld [vmem:[#allocation8 + $0xc0] sm:$0xff]  ;;  %v317_v51 = vld [vmem:[#allocation8 + $0xb8] sm:$0xff] }
  0x4e   :  { %235 = vmatprep.subr.mxu1 %v187_v17  ;;  %548 = vmatprep.subr.mxu0 %v323_v39  ;;  %v303_v48 = vld [vmem:[#allocation8 + $0x48] sm:$0xff]  ;;  %v302_v50 = vld [vmem:[#allocation8 + $0x40] sm:$0xff]  ;;  %v301_v52 = vld [vmem:[#allocation8 + $0x38] sm:$0xff] }
  0x4f   :  { %236 = vmatpush1.msra.mxu1 %v186_v18  ;;  %549 = vmatpush3.msra.mxu0 %v307_v40  ;;  %v316_v53 = vld [vmem:[#allocation8 + $0xb0] sm:$0xff]  ;;  %v315_v55 = vld [vmem:[#allocation8 + $0xa8] sm:$0xff]  ;;  %v314_v57 = vld [vmem:[#allocation8 + $0xa0] sm:$0xff] }
  0x50   :  { %237 = vmatprep.subr.mxu1 %v185_v19  ;;  %550 = vmatprep.subr.mxu0 %v322_v41  ;;  %v300_v54 = vld [vmem:[#allocation8 + $0x30] sm:$0xff]  ;;  %v299_v56 = vld [vmem:[#allocation8 + $0x28] sm:$0xff]  ;;  %v298_v58 = vld [vmem:[#allocation8 + $0x20] sm:$0xff] }
  0x51   :  { %238 = vmatpush1.msra.mxu1 %v184_v20  ;;  %551 = vmatpush3.msra.mxu0 %v306_v42  ;;  %v795_v62 = vld [vmem:[%s817_s5] sm:$0xff]  ;;  %v313_v5 = vld [vmem:[#allocation8 + $0x98] sm:$0xff]  ;;  %v311_v9 = vld [vmem:[#allocation8 + $0x88] sm:$0xff]  ;;  %s735_s5 = smov [#allocation11]  }
  0x52   :  { %239 = vmatprep.subr.mxu1 %v183_v21  ;;  %552 = vmatprep.subr.mxu0 %v321_v43  ;;  %v94_v63 = vrot.slane %v795_v62, %v93_v61  ;;  %v297_v6 = vld [vmem:[#allocation8 + $0x18] sm:$0xff]  ;;  %v312_v7 = vld [vmem:[#allocation8 + $0x90] sm:$0xff]  ;;  %v295_v10 = vld [vmem:[#allocation8 + $0x8] sm:$0xff]  ;;  %v206_v37 = vrot.slane %v795_v62, %v205_v35  ;;  %v210_v38 = vrot.slane %v795_v62, %v209_v36  ;;  %s530_s23 = sshll.u32 %s735_s5, 4  ;;  %s531_s23 = int_to_ptr.vmem [resolvable:$true] %s530_s23 }
  0x53   :  { %240 = vmatpush1.msra.mxu1 %v182_v22  ;;  %553 = vmatpush3.msra.mxu0 %v305_v44  ;;  %v296_v8 = vld [vmem:[#allocation8 + $0x10] sm:$0xff]  ;;  %v310_v11 = vld [vmem:[#allocation8 + $0x80] sm:$0xff]  ;;  %v432_v13 = vld [vmem:[#allocation10 + $0xf8] sm:$0xff]  ;;  %s696_s24 = scalar_lea.vmem %s531_s23, 256  ;;  %p701_p12 = scmp.lt.s32.totalorder %s531_s23, %s531_s23 }
  0x54   :  { %241 = vmatprep.subr.mxu1 %v181_v23  ;;  %554 = vmatprep.subr.mxu0 %v320_v45  ;;  %v294_v12 = vld [vmem:[#allocation8] sm:$0xff]  ;;  %v431_v14 = vld [vmem:[#allocation10 + $0xf0] sm:$0xff]  ;;  %v430_v15 = vld [vmem:[#allocation10 + $0xe8] sm:$0xff]  ;;  %v216_v39 = vrot.slane %v206_v37, %v205_v35  ;;  %v220_v40 = vrot.slane %v210_v38, %v205_v35  ;;  %p697_p11 = scmp.ne.s32.totalorder %s531_s23, %s696_s24  ;;  %p702_p13 = scmp.lt.s32.totalorder %s696_s24, %s696_s24 }
  0x55   :  { %242 = vmatpush1.msra.mxu1 %v180_v24  ;;  %555 = vmatpush3.msra.mxu0 %v304_v46  ;;  %v428_v16 = vld [vmem:[#allocation10 + $0xd8] sm:$0xff]  ;;  %v427_v17 = vld [vmem:[#allocation10 + $0xd0] sm:$0xff]  ;;  %v426_v18 = vld [vmem:[#allocation10 + $0xc8] sm:$0xff] }
  0x56   :  { %243 = vmatprep.subr.mxu1 %v179_v25  ;;  %556 = vmatprep.subr.mxu0 %v319_v47  ;;  %v425_v19 = vld [vmem:[#allocation10 + $0xc0] sm:$0xff]  ;;  %v424_v20 = vld [vmem:[#allocation10 + $0xb8] sm:$0xff]  ;;  %v423_v21 = vld [vmem:[#allocation10 + $0xb0] sm:$0xff]  ;;  %p703_p0 = por %p702_p13, %p701_p12 }
  0x57   :  { %244 = vmatpush1.msra.mxu1 %v178_v26  ;;  %557 = vmatpush3.msra.mxu0 %v303_v48  ;;  %v422_v22 = vld [vmem:[#allocation10 + $0xa8] sm:$0xff]  ;;  %v421_v23 = vld [vmem:[#allocation10 + $0xa0] sm:$0xff]  ;;  %v420_v24 = vld [vmem:[#allocation10 + $0x98] sm:$0xff] }
  0x58   :  { %245 = vmatprep.subr.mxu1 %v177_v27  ;;  %558 = vmatprep.subr.mxu0 %v318_v49  ;;  %v419_v25 = vld [vmem:[#allocation10 + $0x90] sm:$0xff]  ;;  %v418_v26 = vld [vmem:[#allocation10 + $0x88] sm:$0xff]  ;;  %v417_v27 = vld [vmem:[#allocation10 + $0x80] sm:$0xff]  ;;  %p704_p1 = pnand %p703_p0, %p697_p11 }
  0x59   :  { %246 = vmatpush1.msra.mxu1 %v176_v28  ;;  %559 = vmatpush3.msra.mxu0 %v302_v50  ;;  %v416_v28 = vld [vmem:[#allocation10 + $0x78] sm:$0xff]  ;;  %v409_v47 = vld [vmem:[#allocation10 + $0x40] sm:$0xff]  ;;  %v407_v49 = vld [vmem:[#allocation10 + $0x30] sm:$0xff] }
  0x5a   :  { %247 = vmatprep.subr.mxu1 %v175_v29  ;;  %560 = vmatprep.subr.mxu0 %v317_v51  ;;  %v415_v29 = vld [vmem:[#allocation10 + $0x70] sm:$0xff]  ;;  %v408_v48 = vld [vmem:[#allocation10 + $0x38] sm:$0xff]  ;;  %v406_v50 = vld [vmem:[#allocation10 + $0x28] sm:$0xff] }
  0x5b   :  { %248 = vmatpush1.msra.mxu1 %v174_v30  ;;  %561 = vmatpush3.msra.mxu0 %v301_v52  ;;  %v414_v30 = vld [vmem:[#allocation10 + $0x68] sm:$0xff]  ;;  %v405_v51 = vld [vmem:[#allocation10 + $0x20] sm:$0xff]  ;;  %v404_v52 = vld [vmem:[#allocation10 + $0x18] sm:$0xff] }
  0x5c   :  { %249 = vmatprep.subr.mxu1 %v173_v31  ;;  %562 = vmatprep.subr.mxu0 %v316_v53  ;;  %v413_v31 = vld [vmem:[#allocation10 + $0x60] sm:$0xff]  ;;  %v403_v53 = vld [vmem:[#allocation10 + $0x10] sm:$0xff] }
  0x5d   :  { %250 = vmatpush1.msra.mxu1 %v172_v32  ;;  %563 = vmatpush3.msra.mxu0 %v300_v54  ;;  %v412_v32 = vld [vmem:[#allocation10 + $0x58] sm:$0xff]  ;;  %v402_v54 = vld [vmem:[#allocation10 + $0x8] sm:$0xff] }
  0x5e   :  { %251 = vmatprep.subr.mxu1 %v171_v33  ;;  %564 = vmatprep.subr.mxu0 %v315_v55  ;;  %v411_v33 = vld [vmem:[#allocation10 + $0x50] sm:$0xff]  ;;  %v401_v55 = vld [vmem:[#allocation10] sm:$0xff] }
  0x5f   :  { %252 = vmatpush1.msra.mxu1 %v170_v34  ;;  %565 = vmatpush3.msra.mxu0 %v299_v56  ;;  %v410_v34 = vld [vmem:[#allocation10 + $0x48] sm:$0xff]  ;;  %v328_v56 = vsub.s32 2, %v789_v60 }
  0x60   :  { %566 = vmatprep.subr.mxu0 %v314_v57  ;;  %451 = vmatprep.subr.mxu1 %v432_v13 }
  0x61   :  { %567 = vmatpush3.msra.mxu0 %v298_v58  ;;  %v329_v58 = vrot.slane %v795_v62, %v328_v56 }
  0x62   :  { %568 = vmatprep.subr.mxu0 %v313_v5 }
  0x63   :  { %569 = vmatpush3.msra.mxu0 %v297_v6 }
  0x64   :  { %570 = vmatprep.subr.mxu0 %v312_v7 }
  0x65   :  { %571 = vmatpush3.msra.mxu0 %v296_v8 }
  0x66   :  { %572 = vmatprep.subr.mxu0 %v311_v9 }
  0x67   :  { %573 = vmatpush3.msra.mxu0 %v295_v10 }
  0x68   :  { %574 = vmatprep.subr.mxu0 %v310_v11 }
  0x69   :  { %575 = vmatpush3.msra.mxu0 %v294_v12 }
 0x100   :  { %v165_v1 = vpop.f32.mrf.mxu0 }
 0x101   :  { %v166_v2 = vadd.f32 %v165_v1, %v94_v63 }
 0x102   :  { %v583_v3 = vpop.f32.mrf.mxu0 }
 0x103   :  { %v169_v4 = vmax.f32 %v166_v2, 0.0  ;;  %v435_v2 = vsub.s32 3, %v789_v60  ;;  %v439_v3 = vsub.s32 7, %v789_v60 }
 0x105   :  { %286 = vmatmul.mubr.f32.vlgmr.msra.gmra.mxu1 %v169_v4  ;;  %v436_v4 = vrot.slane %v795_v62, %v435_v2  ;;  %v440_v5 = vrot.slane %v795_v62, %v439_v3 }
 0x106   :  { %515 = vmatprep.mubr.f32.mxu1 %v733_v0  ;;  %v429_v0 = vld [vmem:[#allocation10 + $0xe0] sm:$0xff]  ;;  %452 = vmatpush1.msra.mxu1 %v431_v14 }
 0x107   :  { %453 = vmatprep.subr.mxu1 %v430_v15  ;;  %v446_v6 = vrot.slane %v436_v4, %v435_v2  ;;  %v450_v7 = vrot.slane %v440_v5, %v435_v2 }
 0x108   :  { %454 = vmatpush1.msra.mxu1 %v429_v0 }
 0x109   :  { %455 = vmatprep.subr.mxu1 %v428_v16 }
 0x10a   :  { %456 = vmatpush1.msra.mxu1 %v427_v17 }
 0x10b   :  { %457 = vmatprep.subr.mxu1 %v426_v18 }
 0x10c   :  { %458 = vmatpush1.msra.mxu1 %v425_v19 }
 0x10d   :  { %459 = vmatprep.subr.mxu1 %v424_v20 }
 0x10e   :  { %460 = vmatpush1.msra.mxu1 %v423_v21 }
 0x10f   :  { %461 = vmatprep.subr.mxu1 %v422_v22 }
 0x110   :  { %462 = vmatpush1.msra.mxu1 %v421_v23 }
 0x111   :  { %463 = vmatprep.subr.mxu1 %v420_v24 }
 0x112   :  { %464 = vmatpush1.msra.mxu1 %v419_v25 }
 0x113   :  { %465 = vmatprep.subr.mxu1 %v418_v26 }
 0x114   :  { %466 = vmatpush1.msra.mxu1 %v417_v27 }
 0x115   :  { %467 = vmatprep.subr.mxu1 %v416_v28 }
 0x116   :  { %468 = vmatpush1.msra.mxu1 %v415_v29 }
 0x117   :  { %469 = vmatprep.subr.mxu1 %v414_v30 }
 0x118   :  { %470 = vmatpush1.msra.mxu1 %v413_v31 }
 0x119   :  { %471 = vmatprep.subr.mxu1 %v412_v32 }
 0x11a   :  { %472 = vmatpush1.msra.mxu1 %v411_v33 }
 0x11b   :  { %473 = vmatprep.subr.mxu1 %v410_v34 }
 0x11c   :  { %474 = vmatpush1.msra.mxu1 %v409_v47 }
 0x11d   :  { %475 = vmatprep.subr.mxu1 %v408_v48 }
 0x11e   :  { %476 = vmatpush1.msra.mxu1 %v407_v49 }
 0x11f   :  { %477 = vmatprep.subr.mxu1 %v406_v50 }
 0x120   :  { %478 = vmatpush1.msra.mxu1 %v405_v51 }
 0x121   :  { %479 = vmatprep.subr.mxu1 %v404_v52 }
 0x122   :  { %480 = vmatpush1.msra.mxu1 %v403_v53 }
 0x123   :  { %481 = vmatprep.subr.mxu1 %v402_v54 }
 0x124   :  { %482 = vmatpush1.msra.mxu1 %v401_v55 }
 0x1c5   :  { %v287_v41 = vpop.f32.mrf.mxu1 }
 0x1c6   :  { %v288_v42 = vadd.f32 %v287_v41, %v216_v39 }
 0x1c7   :  { %v289_v43 = vpop.f32.mrf.mxu1 }
 0x1c8   :  { %v290_v44 = vadd.f32 %v289_v43, %v220_v40  ;;  %v292_v46 = vmax.f32 %v288_v42, 0.0 }
 0x1ca   :  { %v293_v45 = vmax.f32 %v290_v44, 0.0 }
 0x1cc   :  { %394 = vmatprep.mubr.f32.mxu0 %v293_v45 }
 0x1cd   :  { %395 = vmatmul.mubr.f32.vlgmr.msra.gmra.mxu0 %v292_v46 }
 0x28d   :  { %v576_v57 = vpop.f32.mrf.mxu0 }
 0x28f   :  { %v577_v59 = vpop.f32.mrf.mxu0 }
 0x290   :  { %v578_v61 = vadd.f32 %v577_v59, %v576_v57 }
 0x292   :  { %v397_v63 = vadd.f32 %v578_v61, %v329_v58 }
 0x294   :  { %v400_v1 = vmax.f32 %v397_v63, 0.0 }
 0x296   :  { %516 = vmatmul.mubr.f32.vlgmr.msra.gmra.mxu1 %v400_v1 }
 0x356   :  { %v517_v8 = vpop.f32.mrf.mxu1 }
 0x357   :  { %v518_v9 = vadd.f32 %v517_v8, %v446_v6 }
 0x358   :  { %v519_v10 = vpop.f32.mrf.mxu1 }
 0x359   :  { %522 = vst [vmem:[#allocation11] sm:$0xff] %v518_v9  ;;  %v520_v11 = vadd.f32 %v519_v10, %v450_v7 }
 0x35b   :  { %523 = vst [vmem:[#allocation11 + $0x8] sm:$0xff] %v520_v11 }
 0x35c   :  { %707 = shalt.err (!%p704_p1)
}
 0x35d   :  { %533 = dma.vmem_to_hbm [thread:$0]  %s531_s23, 256, %s818_s6, [#allocation4]  }
 0x35e   :  { %722 = dma.done.wait [#allocation4], 256  }
 0x35f   :  { %723 = vsyncadd [#allocation4], 4294967040 }
 0x360   :  { %537 = vsyncpa [#allocation3], 1 }
 0x361   :  { %538 = vsyncpa [#allocation6], 1 }
 0x362   :  { %539 = vsyncpa [#allocation9], 1 }
 0x363   :  { %540 = vsyncpa [#allocation4], 1 }

</bundles_post_ra>
